<compile_context>
chip_gen: v6e
topology: v6e:2x2x1
jax: 0.10.0
libtpu: 0.0.40
codegen_flags: <defaults>
</compile_context>

<pallas_src>
import functools

import jax
import jax.numpy as jnp
from jax import lax
from jax.experimental import pallas as pl
from jax.experimental.pallas import tpu as pltpu


# ~8 MiB x-blocks: double-buffered = 16 MiB, fits the 32 MiB scoped-VMEM limit
# on every generation (v7x: 64 MiB physical, v5e/v6e: 128 MiB).
_TARGET_BLOCK_BYTES = 8 * 1024 * 1024


def _mean_kernel(x_ref, o_ref, acc_ref, *, inv_l, l_total, tl):
    l = pl.program_id(2)

    @pl.when(l == 0)
    def _():
        acc_ref[...] = jnp.zeros_like(acc_ref)

    x = x_ref[...]                                       # (tb, tl, td), x.dtype
    if l_total % tl != 0:
        # Ragged tail handled in-kernel (no wrapper pad): rows >= L of the last
        # block hold unspecified data -- select them to zero before reducing.
        row = lax.broadcasted_iota(jnp.int32, (x.shape[0], x.shape[1], 1), 1)
        valid = (row + l * tl) < l_total
        x = jnp.where(valid, x, 0)
    # Fuse the f32 upcast into the reduction: only the (tb, td) f32 accumulator
    # stays live, never a full f32 copy of the streamed block.
    acc_ref[...] += jnp.sum(x, axis=1, dtype=jnp.float32)

    @pl.when(l == pl.num_programs(2) - 1)
    def _():
        # Multiply by the compile-time 1/L instead of dividing (differs from
        # torch.mean by at most ~1 ulp; documented, accepted in review).
        o_ref[...] = (acc_ref[...] * inv_l).astype(o_ref.dtype)


def _masked_mean_kernel(x_ref, m_ref, o_ref, acc_ref, den_ref, *, l_total, tl):
    l = pl.program_id(2)

    @pl.when(l == 0)
    def _():
        acc_ref[...] = jnp.zeros_like(acc_ref)
        den_ref[...] = jnp.zeros_like(den_ref)

    x = x_ref[...]                                       # (tb, tl, td), x.dtype
    m = m_ref[...]                                       # (tb, tl) f32 (torch mask.float())
    if l_total % tl != 0:
        row = lax.broadcasted_iota(jnp.int32, m.shape, 1)
        valid = (row + l * tl) < l_total                 # (tb, tl)
        m = jnp.where(valid, m, 0.0)                     # keeps the denominator exact
        x = jnp.where(valid[..., None], x, 0)            # keeps NaN/Inf garbage out of the sum
    xm = x * m.astype(x.dtype)[..., None]                # (tb, tl, td) in x.dtype
    acc_ref[...] += jnp.sum(xm, axis=1, dtype=jnp.float32)   # f32 accumulation
    den_ref[...] += jnp.sum(m, axis=1, keepdims=True)        # (tb, 1) f32

    @pl.when(l == pl.num_programs(2) - 1)
    def _():
        # Exact reciprocal: the epilogue runs once per output tile so approx
        # buys nothing. All-zero mask rows still yield NaN/Inf (matches torch).
        inv = pl.reciprocal(den_ref[...], approx=False)
        o_ref[...] = (acc_ref[...] * inv).astype(o_ref.dtype)


def _pick_tb(B, itemsize):
    # Native packed sublane tile: 8 rows f32, 16 bf16, 32 int8.
    packing = max(1, 4 // max(1, itemsize))
    for t in sorted({8 * packing, 8}, reverse=True):
        if t <= B and B % t == 0:
            return t
    return B


def _largest_128_divisor(D, upper):
    """Largest d <= upper with d % 128 == 0 and D % d == 0 (0 if none)."""
    d = (min(upper, D) // 128) * 128
    while d >= 128:
        if D % d == 0:
            return d
        d -= 128
    return 0


def _pick_tiles(B, L, D, itemsize, target_bytes):
    tb = _pick_tb(B, itemsize)

    # Hidden tile: keep D whole (fully contiguous DMA rows) unless a full-D
    # block at tl=128 would blow the block budget; when tiling, td is always an
    # exact divisor of D.
    td = D
    tl_probe = min(L, 128)
    if tb * tl_probe * D * itemsize > target_bytes and D % 128 == 0:
        budget_td = target_bytes // max(1, tb * tl_probe * itemsize)
        td = _largest_128_divisor(D, budget_td) or 128

    # Guarantee >= 2 parallel output tiles so the second v7x TensorCore has
    # work (measured-neutral on single-core v5e/v6e).
    if (B // tb) * (D // td) < 2:
        split = _largest_128_divisor(td, td // 2)
        if split:
            td = split

    # Sequence tile: fill the block-byte budget, rounded to a multiple of 128
    # so the (tb, tl) mask block stays lane-aligned; prefer an exact divisor of
    # L when one is nearby (skips the in-kernel tail mask entirely).
    tl = target_bytes // max(1, tb * td * itemsize)
    if tl >= L:
        tl = L
    else:
        tl = max(128, (tl // 128) * 128)
        if tl >= L:
            tl = L
        else:
            for t in range(tl, max(128, tl // 2) - 1, -128):
                if L % t == 0:
                    tl = t
                    break
    return tb, tl, td


def global_avg_1d(x, mask=None, *, block_bytes=_TARGET_BLOCK_BYTES):
    """Pallas implementation of GlobalAvg1D.forward (reduce over dim=1).

    x:    (B, L, D)
    mask: (B, L) or None (any dtype; treated like torch's mask.float())
    returns (B, D)
    """
    B, L, D = x.shape
    out_dtype = x.dtype
    tb, tl, td = _pick_tiles(B, L, D, x.dtype.itemsize, block_bytes)

    grid = (B // tb, D // td, pl.cdiv(L, tl))
    out_shape = jax.ShapeDtypeStruct((B, D), out_dtype)

    x_spec = pl.BlockSpec((tb, tl, td), lambda b, d, l: (b, l, d))
    out_spec = pl.BlockSpec((tb, td), lambda b, d, l: (b, d))
    cparams = pltpu.CompilerParams(
        dimension_semantics=("parallel", "parallel", "arbitrary"),
        vmem_limit_bytes=32 * 1024 * 1024,   # safe on v5e/v6e and under v7x's 64 MiB physical
    )

    if mask is None:
        kernel = functools.partial(_mean_kernel, inv_l=float(1.0 / L),
                                   l_total=L, tl=tl)
        return pl.pallas_call(
            kernel,
            out_shape=out_shape,
            grid=grid,
            in_specs=[x_spec],
            out_specs=out_spec,
            scratch_shapes=[pltpu.VMEM((tb, td), jnp.float32)],
            compiler_params=cparams,
        )(x)

    # torch does mask.float(); the f32 (tb, tl) mask block stays lane-dense in
    # VMEM and its HBM traffic is only 1/D of x's (negligible).
    m = mask.astype(jnp.float32)
    m_spec = pl.BlockSpec((tb, tl), lambda b, d, l: (b, l))
    kernel = functools.partial(_masked_mean_kernel, l_total=L, tl=tl)
    return pl.pallas_call(
        kernel,
        out_shape=out_shape,
        grid=grid,
        in_specs=[x_spec, m_spec],
        out_specs=out_spec,
        scratch_shapes=[pltpu.VMEM((tb, td), jnp.float32),   # f32 numerator acc
                        pltpu.VMEM((tb, 1), jnp.float32)],   # f32 denominator acc
        compiler_params=cparams,
    )(x, m)


if __name__ == "__main__":
    key = jax.random.PRNGKey(0)

    def _check(B, L, D, block_bytes=_TARGET_BLOCK_BYTES):
        kx, km = jax.random.split(jax.random.fold_in(key, B * 100000 + L * 100 + D))
        x = jax.random.normal(kx, (B, L, D), dtype=jnp.float32)
        mask = jax.random.uniform(km, (B, L)) > 0.3   # boolean, like a torch bool mask
        mask = mask.at[:, 0].set(True)                # every row has >= 1 valid position

        # Unmasked path
        out_mean = jax.block_until_ready(global_avg_1d(x, block_bytes=block_bytes))
        ref_mean = jnp.mean(x, axis=1)
        assert out_mean.shape == (B, D)
        assert jnp.allclose(out_mean, ref_mean, atol=1e-4, rtol=1e-4)

        # Masked path
        out_masked = jax.block_until_ready(global_avg_1d(x, mask, block_bytes=block_bytes))
        mf = mask.astype(jnp.float32)[..., None]
        ref_masked = jnp.sum(x * mf, axis=1) / jnp.sum(mf, axis=1)
        assert out_masked.shape == (B, D)
        assert jnp.allclose(out_masked, ref_masked, atol=1e-4, rtol=1e-4)

    _check(2, 8, 32)                                # module-spec small shape, single block
    _check(8, 1056, 128)                            # large-block single reduction step
    _check(8, 1056, 128, block_bytes=256 * 1024)    # multi-step streamed reduction + ragged L tail
    _check(8, 300, 640, block_bytes=128 * 1024)     # D tiling (old D=640 bug class) + ragged tail
    print("KERNEL_OK")
</pallas_src>

<mosaic_0001>
module attributes {stable_mosaic.version = 11 : i64} {
  func.func @_mean_kernel(%arg0: i32, %arg1: i32, %arg2: i32, %arg3: memref<2x8x32xf32, #tpu.memory_space<vmem>>, %arg4: memref<2x32xf32, #tpu.memory_space<vmem>>, %arg5: memref<2x32xf32, #tpu.memory_space<vmem>>) attributes {dimension_semantics = [#tpu.dimension_semantics<parallel>, #tpu.dimension_semantics<parallel>, #tpu.dimension_semantics<arbitrary>], iteration_bounds = array<i64: 1, 1, 1>, scalar_prefetch = 0 : i64, scratch_operands = 1 : i64, tpu.core_type = #tpu.core_type<tc>, window_params = [{transform_indices = @transform_0, window_bounds = array<i64: 2, 8, 32>}, {transform_indices = @transform_1, window_bounds = array<i64: 2, 32>}]} {
    %c0_i32 = arith.constant 0 : i32
    %0 = arith.cmpi eq, %arg2, %c0_i32 : i32
    %1 = arith.extui %0 : i1 to i32
    %c0_i32_0 = arith.constant 0 : i32
    %2 = arith.cmpi ne, %1, %c0_i32_0 : i32
    scf.if %2 {
      %cst_9 = arith.constant 0.000000e+00 : f32
      %11 = vector.broadcast %cst_9 : f32 to vector<2x32xf32>
      %c0_10 = arith.constant 0 : index
      %c0_11 = arith.constant 0 : index
      %12 = vector.load %arg5[%c0_10, %c0_11] : memref<2x32xf32, #tpu.memory_space<vmem>>, vector<2x32xf32>
      tpu.vector_store %arg5[%c0_10, %c0_11], %11 {strides = array<i32>} : memref<2x32xf32, #tpu.memory_space<vmem>>, vector<2x32xf32>,
    } else {
    }
    %c0 = arith.constant 0 : index
    %c0_1 = arith.constant 0 : index
    %c0_2 = arith.constant 0 : index
    %3 = vector.load %arg3[%c0, %c0_1, %c0_2] : memref<2x8x32xf32, #tpu.memory_space<vmem>>, vector<2x8x32xf32>
    %c0_3 = arith.constant 0 : index
    %c0_4 = arith.constant 0 : index
    %4 = vector.load %arg5[%c0_3, %c0_4] : memref<2x32xf32, #tpu.memory_space<vmem>>, vector<2x32xf32>
    %cst = arith.constant dense<0.000000e+00> : vector<2x32xf32>
    %5 = vector.multi_reduction <add>, %3, %cst [1] : vector<2x8x32xf32> to vector<2x32xf32>
    %6 = arith.addf %4, %5 : vector<2x32xf32>
    %c0_5 = arith.constant 0 : index
    %c0_6 = arith.constant 0 : index
    %7 = vector.load %arg5[%c0_5, %c0_6] : memref<2x32xf32, #tpu.memory_space<vmem>>, vector<2x32xf32>
    tpu.vector_store %arg5[%c0_5, %c0_6], %6 {strides = array<i32>} : memref<2x32xf32, #tpu.memory_space<vmem>>, vector<2x32xf32>,
    %c0_i32_7 = arith.constant 0 : i32
    %8 = arith.cmpi eq, %arg2, %c0_i32_7 : i32
    %9 = arith.extui %8 : i1 to i32
    %c0_i32_8 = arith.constant 0 : i32
    %10 = arith.cmpi ne, %9, %c0_i32_8 : i32
    scf.if %10 {
      %c0_9 = arith.constant 0 : index
      %c0_10 = arith.constant 0 : index
      %11 = vector.load %arg5[%c0_9, %c0_10] : memref<2x32xf32, #tpu.memory_space<vmem>>, vector<2x32xf32>
      %cst_11 = arith.constant 1.250000e-01 : f32
      %12 = vector.broadcast %cst_11 : f32 to vector<2x32xf32>
      %13 = arith.mulf %11, %12 : vector<2x32xf32>
      %c0_12 = arith.constant 0 : index
      %c0_13 = arith.constant 0 : index
      %14 = vector.load %arg4[%c0_12, %c0_13] : memref<2x32xf32, #tpu.memory_space<vmem>>, vector<2x32xf32>
      tpu.vector_store %arg4[%c0_12, %c0_13], %13 {strides = array<i32>} : memref<2x32xf32, #tpu.memory_space<vmem>>, vector<2x32xf32>,
    } else {
    }
    return
  }
  func.func @transform_0(%arg0: i32, %arg1: i32, %arg2: i32) -> (i32, i32, i32) {
    %c0_i32 = arith.constant 0 : i32
    return %arg0, %arg2, %arg1 : i32, i32, i32
  }
  func.func @transform_1(%arg0: i32, %arg1: i32, %arg2: i32) -> (i32, i32) {
    %c0_i32 = arith.constant 0 : i32
    return %arg0, %arg1 : i32, i32
  }
}

</mosaic_0001>

<bundles_post_ra>
// kernel: tpu_custom_call.1
= control target key start
LH: loop header
LB: loop body
LE: loop exit
PB: predicated region body
PF: predicated region fallthrough
CT: control target
= control target key end

     0   :  { %6 = vsyncpa [#allocation4], 0  ;;  %s149_s0 = inlined_call_operand.hbm [shape: f32[2,8,32], index: 0, kind: input, shape index: {}]   ;;  %s150_s1 = inlined_call_operand.hbm [shape: f32[2,32], index: 1, kind: output, shape index: {}]  }
   0x1   :  { %7 = vsyncpa [#allocation5], 0  ;;  %s125_s6 = smov [#allocation3]  }
   0x2   :  { %s13_s7 = sshll.u32 %s125_s6, 4  ;;  %s14_s7 = int_to_ptr.vmem [resolvable:$true] %s13_s7 }
   0x3   :  { %s89_s8 = scalar_lea.vmem %s14_s7, 256  ;;  %p94_p1 = scmp.lt.s32.totalorder %s14_s7, %s14_s7 }
   0x4   :  { %p90_p0 = scmp.ne.s32.totalorder %s14_s7, %s89_s8  ;;  %p95_p2 = scmp.lt.s32.totalorder %s89_s8, %s89_s8 }
   0x6   :  { %p96_p3 = por %p95_p2, %p94_p1 }
   0x8   :  { %p97_p4 = pnand %p96_p3, %p90_p0 }
   0xa   :  { %100 = shalt.err (!%p97_p4)
}
   0xb   :  { %s126_s9 = smov 128   ;;  %s127_s10 = smov 8  }
   0xc   :  { %19 = dma.hbm_to_vmem [thread:$0]  %s149_s0, 256, %s14_s7, [#allocation4], %s126_s9, %s126_s9, %s127_s10  }
   0xd   :  { %121 = dma.done.wait [#allocation4], 256  }
   0xe   :  { %122 = vsyncadd [#allocation4], 4294967040  ;;  %vm27_vm0 = vcmask 254976   ;;  %v128_v0 = vmov 0.0   ;;  %vm32_vm1 = vcmask 261120   ;;  %v29_v1 = vld [vmem:[#allocation3] sm:$0xff] }
   0xf   :  { %28 = vst.msk [vmem:[#allocation2] sm:$0x3] %vm27_vm0, %v128_v0  ;;  %v30_v2 = vld [vmem:[#allocation3 + $0x8] sm:$0xff]  ;;  %v33_v3 = vsel %vm32_vm1, %v29_v1, 0.0  ;;  %vm49_vm2 = vcmask 1041409   ;;  %s129_s0 = smov [#allocation6]  }
  0x10   :  { %v40_v4 = vsel %vm32_vm1, %v30_v2, 0.0  ;;  %v34_v5 = vrot.slane %v33_v3, 4  ;;  %s67_s13 = sshll.u32 %s129_s0, 4  ;;  %s68_s13 = int_to_ptr.vmem [resolvable:$true] %s67_s13 }
  0x11   :  { %v41_v6 = vrot.slane %v40_v4, 4  ;;  %s101_s14 = scalar_lea.vmem %s68_s13, 32  ;;  %p106_p6 = scmp.lt.s32.totalorder %s68_s13, %s68_s13 }
  0x12   :  { %v35_v7 = vadd.f32 %v34_v5, %v33_v3  ;;  %p102_p5 = scmp.ne.s32.totalorder %s68_s13, %s101_s14  ;;  %p107_p7 = scmp.lt.s32.totalorder %s101_s14, %s101_s14 }
  0x13   :  { %v42_v8 = vadd.f32 %v41_v6, %v40_v4 }
  0x14   :  { %v36_v9 = vrot.slane %v35_v7, 2  ;;  %p108_p8 = por %p107_p7, %p106_p6 }
  0x15   :  { %v43_v10 = vrot.slane %v42_v8, 2 }
  0x16   :  { %v37_v11 = vadd.f32 %v36_v9, %v35_v7  ;;  %v31_v15 = vld [vmem:[#allocation2] sm:$0x3]  ;;  %p109_p9 = pnand %p108_p8, %p102_p5 }
  0x17   :  { %v44_v12 = vadd.f32 %v43_v10, %v42_v8 }
  0x18   :  { %v38_v13 = vrot.slane %v37_v11, 1 }
  0x19   :  { %v45_v14 = vrot.slane %v44_v12, 1 }
  0x1a   :  { %v39_v16 = vadd.f32 %v38_v13, %v37_v11 }
  0x1b   :  { %v46_v17 = vadd.f32 %v45_v14, %v44_v12 }
  0x1d   :  { %v50_v18 = vsel %vm49_vm2, %v46_v17, %v39_v16 }
  0x1e   :  { %v52_v19 = vadd.f32 %v50_v18, %v31_v15 }
  0x20   :  { %54 = vst.msk [vmem:[#allocation2] sm:$0x3] %vm27_vm0, %v52_v19 }
  0x27   :  { %v58_v20 = vld [vmem:[#allocation2] sm:$0x3] }
  0x28   :  { %v59_v21 = vmul.f32 0.125, %v58_v20 }
  0x2a   :  { %60 = vst.msk [vmem:[#allocation6] sm:$0x3] %vm27_vm0, %v59_v21 }
  0x2b   :  { %112 = shalt.err (!%p109_p9)
}
  0x2c   :  { %70 = dma.vmem_to_hbm [thread:$0]  %s68_s13, 32, %s150_s1, [#allocation5]  }
  0x2d   :  { %123 = dma.done.wait [#allocation5], 32  }
  0x2e   :  { %124 = vsyncadd [#allocation5], 4294967264 }
  0x2f   :  { %74 = vsyncpa [#allocation4], 1 }
  0x30   :  { %75 = vsyncpa [#allocation5], 1 }

</bundles_post_ra>
